<compile_context>
chip_gen: v7x
topology: tpu7x:2x2x1
jax: 0.10.0
libtpu: 0.0.40
codegen_flags: <defaults>
</compile_context>

<pallas_src>
import math

import jax
import jax.numpy as jnp
from jax.experimental import pallas as pl
from jax.experimental.pallas import tpu as pltpu

# ------------------------- model config (small synthetic shapes) -------------
MAX_LV = 3           # cmd_args.max_lv
LATENT_DIM = 32      # cmd_args.latent_dim
OUT_DIM = 64         # cmd_args.out_dim
HIDDEN = 32          # cmd_args.hidden
NUM_NODE_FEATS = 16  # MOLLIB.num_node_feats
NUM_EDGE_FEATS = 8   # MOLLIB.num_edge_feats

# per graph-batch (dense stand-ins for the sparse n2n/e2n/subg matrices)
N_GRAPHS = 2
N_NODES = 24
N_EDGES = 40

# independent graph-batches processed per pallas_call (grid axis)
N_BATCHES = 8

# ------------------------- packed weight slab layout -------------------------
LANES = 128
R_N2L = 0                               # w_n2l  (16, 32)
R_E2L = R_N2L + NUM_NODE_FEATS          # 16 : w_e2l  (8, 32)
R_CONV = R_E2L + NUM_EDGE_FEATS         # 24 : w_conv (32, 32)
R_OUT = R_CONV + LATENT_DIM             # 56 : w_out  (32, 64)
R_H1 = R_OUT + LATENT_DIM               # 88 : w_h1   (64, 32)
R_H2 = R_H1 + OUT_DIM                   # 152: w_h2   (32, 1)
R_BIAS = R_H2 + HIDDEN                  # 184: 6 bias rows (padded to 8)
SLAB_ROWS = R_BIAS + 8                  # 192


def regressor_kernel(node_feat_ref, edge_feat_ref, n2n_ref, e2n_ref, subg_ref,
                     labels_ref, w_ref, out_ref):
    f32 = jnp.float32
    bf16 = jnp.bfloat16

    # ---- weights: one resident slab, static sub-views (loaded once per slice) ----
    w_n2l = w_ref[R_N2L:R_N2L + NUM_NODE_FEATS, :LATENT_DIM]
    w_e2l = w_ref[R_E2L:R_E2L + NUM_EDGE_FEATS, :LATENT_DIM]
    w_conv = w_ref[R_CONV:R_CONV + LATENT_DIM, :LATENT_DIM]
    w_out = w_ref[R_OUT:R_OUT + LATENT_DIM, :OUT_DIM]
    w_h1 = w_ref[R_H1:R_H1 + OUT_DIM, :HIDDEN]
    w_h2 = w_ref[R_H2:R_H2 + HIDDEN, :1]
    b_n2l = w_ref[R_BIAS + 0:R_BIAS + 1, :LATENT_DIM]
    b_e2l = w_ref[R_BIAS + 1:R_BIAS + 2, :LATENT_DIM]
    b_conv = w_ref[R_BIAS + 2:R_BIAS + 3, :LATENT_DIM]
    b_out = w_ref[R_BIAS + 3:R_BIAS + 4, :OUT_DIM]
    b_h1 = w_ref[R_BIAS + 4:R_BIAS + 5, :HIDDEN]
    b_h2 = w_ref[R_BIAS + 5:R_BIAS + 6, :1]

    node_feat = node_feat_ref[...]   # (N, Fn) f32
    edge_feat = edge_feat_ref[...]   # (E, Fe) f32
    n2n = n2n_ref[...]               # (N, N)  bf16 0/1
    e2n = e2n_ref[...]               # (N, E)  bf16 0/1
    subg = subg_ref[...]             # (B, N)  bf16 0/1
    labels = labels_ref[...]         # (B, 1)  f32

    # ---------------- EmbedMeanField.mean_field ----------------
    # node path
    input_node_linear = jnp.dot(node_feat, w_n2l, preferred_element_type=f32) + b_n2l

    # edge path, reassociated (exact): e2n @ (X @ W + b) = (e2n @ X) @ W + rowsum(e2n) * b
    pooled_edge = jnp.dot(e2n, edge_feat.astype(bf16), preferred_element_type=f32)  # (N, Fe)
    edge_deg = jnp.sum(e2n.astype(f32), axis=1, keepdims=True)                      # (N, 1)
    e2npool = jnp.dot(pooled_edge, w_e2l, preferred_element_type=f32) + edge_deg * b_e2l

    input_message = input_node_linear + e2npool
    cur = jnp.maximum(input_message, 0.0)
    msg_plus_bconv = input_message + b_conv   # hoisted bias broadcast (loop invariant)

    # max_lv rounds of mean-field message passing (static unroll; traced once)
    for _ in range(MAX_LV):
        n2npool = jnp.dot(n2n, cur.astype(bf16), preferred_element_type=f32)       # (N, L)
        node_linear = jnp.dot(n2npool, w_conv, preferred_element_type=f32)
        cur = jnp.maximum(node_linear + msg_plus_bconv, 0.0)

    reluact = jnp.maximum(jnp.dot(cur, w_out, preferred_element_type=f32) + b_out, 0.0)
    y_potential = jnp.dot(subg, reluact.astype(bf16), preferred_element_type=f32)   # (B, OUT)
    embed = jnp.maximum(y_potential, 0.0)

    # ---------------- MLPRegression ----------------
    h1 = jnp.maximum(jnp.dot(embed, w_h1, preferred_element_type=f32) + b_h1, 0.0)
    pred = jnp.dot(h1, w_h2, preferred_element_type=f32) + b_h2                     # (B, 1)

    diff = pred - labels
    mse = jnp.mean(diff * diff, keepdims=True)       # (1, 1)
    mae = jnp.mean(jnp.abs(diff), keepdims=True)     # (1, 1)

    # lane-dense packed output (single full-lane store):
    #   lane 0 = pred per graph, lane 1 = mse (broadcast), lane 2 = mae (broadcast)
    lane = jax.lax.broadcasted_iota(jnp.int32, (N_GRAPHS, LANES), 1)
    packed = jnp.where(lane == 0, pred,
             jnp.where(lane == 1, mse,
             jnp.where(lane == 2, mae, 0.0)))
    out_ref[...] = packed


def regressor_forward(node_feat, edge_feat, n2n, e2n, subg, labels, wslab):
    """Batched forward: one pallas_call over N_BATCHES independent graph-batches.

    Returns (pred [NB, B, 1], mae [NB], mse [NB]) — per graph-batch, matching
    MLPRegression.forward(x, y) semantics for each batch.
    """
    nb = node_feat.shape[0]
    packed = pl.pallas_call(
        regressor_kernel,
        out_shape=jax.ShapeDtypeStruct((nb, N_GRAPHS, LANES), jnp.float32),
        grid=(nb,),
        in_specs=[
            pl.BlockSpec((None, N_NODES, NUM_NODE_FEATS), lambda b: (b, 0, 0)),
            pl.BlockSpec((None, N_EDGES, NUM_EDGE_FEATS), lambda b: (b, 0, 0)),
            pl.BlockSpec((None, N_NODES, N_NODES), lambda b: (b, 0, 0)),
            pl.BlockSpec((None, N_NODES, N_EDGES), lambda b: (b, 0, 0)),
            pl.BlockSpec((None, N_GRAPHS, N_NODES), lambda b: (b, 0, 0)),
            pl.BlockSpec((None, N_GRAPHS, 1), lambda b: (b, 0, 0)),
            pl.BlockSpec((SLAB_ROWS, LANES), lambda b: (0, 0)),   # resident weights
        ],
        out_specs=pl.BlockSpec((None, N_GRAPHS, LANES), lambda b: (b, 0, 0)),
        compiler_params=pltpu.CompilerParams(dimension_semantics=("parallel",)),
    )(node_feat, edge_feat, n2n, e2n, subg, labels, wslab)

    pred = packed[:, :, 0:1]    # (NB, B, 1)
    mse = packed[:, 0, 1]       # (NB,)
    mae = packed[:, 0, 2]       # (NB,)
    return pred, mae, mse


def init_linear(key, fan_in, fan_out):
    # deterministic, torch-nn.Linear-style uniform init; weight stored transposed [Fin, Fout]
    k1, k2 = jax.random.split(key)
    bound = 1.0 / math.sqrt(fan_in)
    w = jax.random.uniform(k1, (fan_in, fan_out), jnp.float32, -bound, bound)
    b = jax.random.uniform(k2, (1, fan_out), jnp.float32, -bound, bound)
    return w, b


def pack_params(params):
    """Pack the 12 weight/bias tensors into one (SLAB_ROWS, 128) f32 slab (1 DMA)."""
    (w_n2l, b_n2l, w_e2l, b_e2l, w_conv, b_conv, w_out, b_out,
     w_h1, b_h1, w_h2, b_h2) = params
    slab = jnp.zeros((SLAB_ROWS, LANES), jnp.float32)
    slab = slab.at[R_N2L:R_N2L + NUM_NODE_FEATS, :LATENT_DIM].set(w_n2l)
    slab = slab.at[R_E2L:R_E2L + NUM_EDGE_FEATS, :LATENT_DIM].set(w_e2l)
    slab = slab.at[R_CONV:R_CONV + LATENT_DIM, :LATENT_DIM].set(w_conv)
    slab = slab.at[R_OUT:R_OUT + LATENT_DIM, :OUT_DIM].set(w_out)
    slab = slab.at[R_H1:R_H1 + OUT_DIM, :HIDDEN].set(w_h1)
    slab = slab.at[R_H2:R_H2 + HIDDEN, :1].set(w_h2)
    slab = slab.at[R_BIAS + 0, :LATENT_DIM].set(b_n2l[0])
    slab = slab.at[R_BIAS + 1, :LATENT_DIM].set(b_e2l[0])
    slab = slab.at[R_BIAS + 2, :LATENT_DIM].set(b_conv[0])
    slab = slab.at[R_BIAS + 3, :OUT_DIM].set(b_out[0])
    slab = slab.at[R_BIAS + 4, :HIDDEN].set(b_h1[0])
    slab = slab.at[R_BIAS + 5, :1].set(b_h2[0])
    return slab


if __name__ == "__main__":
    key = jax.random.PRNGKey(0)
    keys = jax.random.split(key, 12)

    # ---- parameters (deterministic init; shapes from EmbedMeanField / MLPRegression) ----
    w_n2l, b_n2l = init_linear(keys[0], NUM_NODE_FEATS, LATENT_DIM)   # w_n2l
    w_e2l, b_e2l = init_linear(keys[1], NUM_EDGE_FEATS, LATENT_DIM)   # w_e2l
    w_conv, b_conv = init_linear(keys[2], LATENT_DIM, LATENT_DIM)     # conv_params
    w_out, b_out = init_linear(keys[3], LATENT_DIM, OUT_DIM)          # out_params
    w_h1, b_h1 = init_linear(keys[4], OUT_DIM, HIDDEN)                # h1_weights
    w_h2, b_h2 = init_linear(keys[5], HIDDEN, 1)                      # h2_weights
    wslab = pack_params((w_n2l, b_n2l, w_e2l, b_e2l, w_conv, b_conv,
                         w_out, b_out, w_h1, b_h1, w_h2, b_h2))

    # ---- synthetic batched graph data (N_BATCHES independent graph-batches) ----
    node_feat = jax.random.normal(keys[6], (N_BATCHES, N_NODES, NUM_NODE_FEATS), jnp.float32)
    edge_feat = jax.random.normal(keys[7], (N_BATCHES, N_EDGES, NUM_EDGE_FEATS), jnp.float32)
    n2n = (jax.random.uniform(keys[8], (N_BATCHES, N_NODES, N_NODES)) < 0.2).astype(jnp.float32)
    n2n = n2n * (1.0 - jnp.eye(N_NODES, dtype=jnp.float32))            # no self loops
    e2n = (jax.random.uniform(keys[9], (N_BATCHES, N_NODES, N_EDGES)) < 0.1).astype(jnp.float32)
    # subgraph pooling: first half of nodes -> graph 0, second half -> graph 1
    subg = jnp.zeros((N_BATCHES, N_GRAPHS, N_NODES), jnp.float32)
    subg = subg.at[:, 0, : N_NODES // 2].set(1.0).at[:, 1, N_NODES // 2:].set(1.0)
    labels = jax.random.normal(keys[10], (N_BATCHES, N_GRAPHS, 1), jnp.float32)

    # 0/1 adjacency matrices in bf16 (exact for 0/1): halves HBM/VMEM bytes, bf16 MXU rate
    n2n = n2n.astype(jnp.bfloat16)
    e2n = e2n.astype(jnp.bfloat16)
    subg = subg.astype(jnp.bfloat16)

    pred, mae, mse = regressor_forward(node_feat, edge_feat, n2n, e2n, subg,
                                       labels, wslab)
    jax.block_until_ready((pred, mae, mse))
    assert pred.shape == (N_BATCHES, N_GRAPHS, 1)
    assert mae.shape == (N_BATCHES,) and mse.shape == (N_BATCHES,)
    assert bool(jnp.all(jnp.isfinite(pred)))
    print("KERNEL_OK")
</pallas_src>

<mosaic_0001>
module attributes {stable_mosaic.version = 11 : i64} {
  func.func @regressor_kernel(%arg0: i32, %arg1: memref<1x24x16xf32, #tpu.memory_space<vmem>>, %arg2: memref<1x40x8xf32, #tpu.memory_space<vmem>>, %arg3: memref<1x24x24xbf16, #tpu.memory_space<vmem>>, %arg4: memref<1x24x40xbf16, #tpu.memory_space<vmem>>, %arg5: memref<1x2x24xbf16, #tpu.memory_space<vmem>>, %arg6: memref<1x2x1xf32, #tpu.memory_space<vmem>>, %arg7: memref<192x128xf32, #tpu.memory_space<vmem>>, %arg8: memref<1x2x128xf32, #tpu.memory_space<vmem>>) attributes {dimension_semantics = [#tpu.dimension_semantics<parallel>], iteration_bounds = array<i64: 8>, scalar_prefetch = 0 : i64, scratch_operands = 0 : i64, tpu.core_type = #tpu.core_type<tc>, window_params = [{transform_indices = @transform_0, window_bounds = array<i64: 1, 24, 16>}, {transform_indices = @transform_1, window_bounds = array<i64: 1, 40, 8>}, {transform_indices = @transform_2, window_bounds = array<i64: 1, 24, 24>}, {transform_indices = @transform_3, window_bounds = array<i64: 1, 24, 40>}, {transform_indices = @transform_4, window_bounds = array<i64: 1, 2, 24>}, {transform_indices = @transform_5, window_bounds = array<i64: 1, 2, 1>}, {pipeline_mode = #tpu.pipeline_mode<synchronous>, transform_indices = @transform_6, window_bounds = array<i64: 192, 128>}, {transform_indices = @transform_7, window_bounds = array<i64: 1, 2, 128>}]} {
    %c0 = arith.constant 0 : index
    %c0_0 = arith.constant 0 : index
    %0 = vector.load %arg7[%c0, %c0_0] : memref<192x128xf32, #tpu.memory_space<vmem>>, vector<16x32xf32>
    %c16 = arith.constant 16 : index
    %c0_1 = arith.constant 0 : index
    %1 = vector.load %arg7[%c16, %c0_1] : memref<192x128xf32, #tpu.memory_space<vmem>>, vector<8x32xf32>
    %c24 = arith.constant 24 : index
    %c0_2 = arith.constant 0 : index
    %2 = vector.load %arg7[%c24, %c0_2] : memref<192x128xf32, #tpu.memory_space<vmem>>, vector<32x32xf32>
    %c56 = arith.constant 56 : index
    %c0_3 = arith.constant 0 : index
    %3 = vector.load %arg7[%c56, %c0_3] : memref<192x128xf32, #tpu.memory_space<vmem>>, vector<32x64xf32>
    %c88 = arith.constant 88 : index
    %c0_4 = arith.constant 0 : index
    %4 = vector.load %arg7[%c88, %c0_4] : memref<192x128xf32, #tpu.memory_space<vmem>>, vector<64x32xf32>
    %c152 = arith.constant 152 : index
    %c0_5 = arith.constant 0 : index
    %5 = vector.load %arg7[%c152, %c0_5] : memref<192x128xf32, #tpu.memory_space<vmem>>, vector<32x1xf32>
    %c184 = arith.constant 184 : index
    %c0_6 = arith.constant 0 : index
    %6 = vector.load %arg7[%c184, %c0_6] : memref<192x128xf32, #tpu.memory_space<vmem>>, vector<1x32xf32>
    %c185 = arith.constant 185 : index
    %c0_7 = arith.constant 0 : index
    %7 = vector.load %arg7[%c185, %c0_7] : memref<192x128xf32, #tpu.memory_space<vmem>>, vector<1x32xf32>
    %c186 = arith.constant 186 : index
    %c0_8 = arith.constant 0 : index
    %8 = vector.load %arg7[%c186, %c0_8] : memref<192x128xf32, #tpu.memory_space<vmem>>, vector<1x32xf32>
    %c187 = arith.constant 187 : index
    %c0_9 = arith.constant 0 : index
    %9 = vector.load %arg7[%c187, %c0_9] : memref<192x128xf32, #tpu.memory_space<vmem>>, vector<1x64xf32>
    %c188 = arith.constant 188 : index
    %c0_10 = arith.constant 0 : index
    %10 = vector.load %arg7[%c188, %c0_10] : memref<192x128xf32, #tpu.memory_space<vmem>>, vector<1x32xf32>
    %c189 = arith.constant 189 : index
    %c0_11 = arith.constant 0 : index
    %11 = vector.load %arg7[%c189, %c0_11] : memref<192x128xf32, #tpu.memory_space<vmem>>, vector<1x1xf32>
    %c0_12 = arith.constant 0 : index
    %c0_13 = arith.constant 0 : index
    %c0_14 = arith.constant 0 : index
    %12 = vector.load %arg1[%c0_12, %c0_13, %c0_14] : memref<1x24x16xf32, #tpu.memory_space<vmem>>, vector<1x24x16xf32>
    %13 = vector.shape_cast %12 : vector<1x24x16xf32> to vector<24x16xf32>
    %c0_15 = arith.constant 0 : index
    %c0_16 = arith.constant 0 : index
    %c0_17 = arith.constant 0 : index
    %14 = vector.load %arg2[%c0_15, %c0_16, %c0_17] : memref<1x40x8xf32, #tpu.memory_space<vmem>>, vector<1x40x8xf32>
    %15 = vector.shape_cast %14 : vector<1x40x8xf32> to vector<40x8xf32>
    %c0_18 = arith.constant 0 : index
    %c0_19 = arith.constant 0 : index
    %c0_20 = arith.constant 0 : index
    %16 = vector.load %arg3[%c0_18, %c0_19, %c0_20] : memref<1x24x24xbf16, #tpu.memory_space<vmem>>, vector<1x24x24xbf16>
    %17 = vector.shape_cast %16 : vector<1x24x24xbf16> to vector<24x24xbf16>
    %c0_21 = arith.constant 0 : index
    %c0_22 = arith.constant 0 : index
    %c0_23 = arith.constant 0 : index
    %18 = vector.load %arg4[%c0_21, %c0_22, %c0_23] : memref<1x24x40xbf16, #tpu.memory_space<vmem>>, vector<1x24x40xbf16>
    %19 = vector.shape_cast %18 : vector<1x24x40xbf16> to vector<24x40xbf16>
    %c0_24 = arith.constant 0 : index
    %c0_25 = arith.constant 0 : index
    %c0_26 = arith.constant 0 : index
    %20 = vector.load %arg5[%c0_24, %c0_25, %c0_26] : memref<1x2x24xbf16, #tpu.memory_space<vmem>>, vector<1x2x24xbf16>
    %21 = vector.shape_cast %20 : vector<1x2x24xbf16> to vector<2x24xbf16>
    %c0_27 = arith.constant 0 : index
    %c0_28 = arith.constant 0 : index
    %c0_29 = arith.constant 0 : index
    %22 = vector.load %arg6[%c0_27, %c0_28, %c0_29] : memref<1x2x1xf32, #tpu.memory_space<vmem>>, vector<1x2x1xf32>
    %23 = vector.shape_cast %22 : vector<1x2x1xf32> to vector<2x1xf32>
    %cst = arith.constant dense<0.000000e+00> : vector<24x32xf32>
    %24 = tpu.matmul %13, %0, %cst {dimension_numbers = #tpu.dot_dimension_numbers<[1], [0], [0], [1], [0, 0, 1, 1], [], []>} : vector<24x16xf32>, vector<16x32xf32>, vector<24x32xf32> -> vector<24x32xf32>
    %25 = vector.broadcast %6 : vector<1x32xf32> to vector<24x32xf32>
    %26 = arith.addf %24, %25 : vector<24x32xf32>
    %27 = arith.truncf %15 : vector<40x8xf32> to vector<40x8xbf16>
    %cst_30 = arith.constant dense<0.000000e+00> : vector<24x8xf32>
    %28 = tpu.matmul %19, %27, %cst_30 {dimension_numbers = #tpu.dot_dimension_numbers<[1], [0], [0], [1], [0, 0, 1, 1], [], []>} : vector<24x40xbf16>, vector<40x8xbf16>, vector<24x8xf32> -> vector<24x8xf32>
    %29 = arith.extf %19 : vector<24x40xbf16> to vector<24x40xf32>
    %cst_31 = arith.constant dense<0.000000e+00> : vector<24xf32>
    %30 = vector.multi_reduction <add>, %29, %cst_31 [1] : vector<24x40xf32> to vector<24xf32>
    %31 = vector.shape_cast %30 : vector<24xf32> to vector<24x1xf32>
    %cst_32 = arith.constant dense<0.000000e+00> : vector<24x32xf32>
    %32 = tpu.matmul %28, %1, %cst_32 {dimension_numbers = #tpu.dot_dimension_numbers<[1], [0], [0], [1], [0, 0, 1, 1], [], []>} : vector<24x8xf32>, vector<8x32xf32>, vector<24x32xf32> -> vector<24x32xf32>
    %33 = vector.broadcast %31 : vector<24x1xf32> to vector<24x32xf32>
    %34 = vector.broadcast %7 : vector<1x32xf32> to vector<24x32xf32>
    %35 = arith.mulf %33, %34 : vector<24x32xf32>
    %36 = arith.addf %32, %35 : vector<24x32xf32>
    %37 = arith.addf %26, %36 : vector<24x32xf32>
    %cst_33 = arith.constant 0.000000e+00 : f32
    %38 = vector.broadcast %cst_33 : f32 to vector<24x32xf32>
    %39 = arith.maximumf %37, %38 : vector<24x32xf32>
    %40 = vector.broadcast %8 : vector<1x32xf32> to vector<24x32xf32>
    %41 = arith.addf %37, %40 : vector<24x32xf32>
    %42 = arith.truncf %39 : vector<24x32xf32> to vector<24x32xbf16>
    %cst_34 = arith.constant dense<0.000000e+00> : vector<24x32xf32>
    %43 = tpu.matmul %17, %42, %cst_34 {dimension_numbers = #tpu.dot_dimension_numbers<[1], [0], [0], [1], [0, 0, 1, 1], [], []>} : vector<24x24xbf16>, vector<24x32xbf16>, vector<24x32xf32> -> vector<24x32xf32>
    %cst_35 = arith.constant dense<0.000000e+00> : vector<24x32xf32>
    %44 = tpu.matmul %43, %2, %cst_35 {dimension_numbers = #tpu.dot_dimension_numbers<[1], [0], [0], [1], [0, 0, 1, 1], [], []>} : vector<24x32xf32>, vector<32x32xf32>, vector<24x32xf32> -> vector<24x32xf32>
    %45 = arith.addf %44, %41 : vector<24x32xf32>
    %cst_36 = arith.constant 0.000000e+00 : f32
    %46 = vector.broadcast %cst_36 : f32 to vector<24x32xf32>
    %47 = arith.maximumf %45, %46 : vector<24x32xf32>
    %48 = arith.truncf %47 : vector<24x32xf32> to vector<24x32xbf16>
    %cst_37 = arith.constant dense<0.000000e+00> : vector<24x32xf32>
    %49 = tpu.matmul %17, %48, %cst_37 {dimension_numbers = #tpu.dot_dimension_numbers<[1], [0], [0], [1], [0, 0, 1, 1], [], []>} : vector<24x24xbf16>, vector<24x32xbf16>, vector<24x32xf32> -> vector<24x32xf32>
    %cst_38 = arith.constant dense<0.000000e+00> : vector<24x32xf32>
    %50 = tpu.matmul %49, %2, %cst_38 {dimension_numbers = #tpu.dot_dimension_numbers<[1], [0], [0], [1], [0, 0, 1, 1], [], []>} : vector<24x32xf32>, vector<32x32xf32>, vector<24x32xf32> -> vector<24x32xf32>
    %51 = arith.addf %50, %41 : vector<24x32xf32>
    %cst_39 = arith.constant 0.000000e+00 : f32
    %52 = vector.broadcast %cst_39 : f32 to vector<24x32xf32>
    %53 = arith.maximumf %51, %52 : vector<24x32xf32>
    %54 = arith.truncf %53 : vector<24x32xf32> to vector<24x32xbf16>
    %cst_40 = arith.constant dense<0.000000e+00> : vector<24x32xf32>
    %55 = tpu.matmul %17, %54, %cst_40 {dimension_numbers = #tpu.dot_dimension_numbers<[1], [0], [0], [1], [0, 0, 1, 1], [], []>} : vector<24x24xbf16>, vector<24x32xbf16>, vector<24x32xf32> -> vector<24x32xf32>
    %cst_41 = arith.constant dense<0.000000e+00> : vector<24x32xf32>
    %56 = tpu.matmul %55, %2, %cst_41 {dimension_numbers = #tpu.dot_dimension_numbers<[1], [0], [0], [1], [0, 0, 1, 1], [], []>} : vector<24x32xf32>, vector<32x32xf32>, vector<24x32xf32> -> vector<24x32xf32>
    %57 = arith.addf %56, %41 : vector<24x32xf32>
    %cst_42 = arith.constant 0.000000e+00 : f32
    %58 = vector.broadcast %cst_42 : f32 to vector<24x32xf32>
    %59 = arith.maximumf %57, %58 : vector<24x32xf32>
    %cst_43 = arith.constant dense<0.000000e+00> : vector<24x64xf32>
    %60 = tpu.matmul %59, %3, %cst_43 {dimension_numbers = #tpu.dot_dimension_numbers<[1], [0], [0], [1], [0, 0, 1, 1], [], []>} : vector<24x32xf32>, vector<32x64xf32>, vector<24x64xf32> -> vector<24x64xf32>
    %61 = vector.broadcast %9 : vector<1x64xf32> to vector<24x64xf32>
    %62 = arith.addf %60, %61 : vector<24x64xf32>
    %cst_44 = arith.constant 0.000000e+00 : f32
    %63 = vector.broadcast %cst_44 : f32 to vector<24x64xf32>
    %64 = arith.maximumf %62, %63 : vector<24x64xf32>
    %65 = arith.truncf %64 : vector<24x64xf32> to vector<24x64xbf16>
    %cst_45 = arith.constant dense<0.000000e+00> : vector<2x64xf32>
    %66 = tpu.matmul %21, %65, %cst_45 {dimension_numbers = #tpu.dot_dimension_numbers<[1], [0], [0], [1], [0, 0, 1, 1], [], []>} : vector<2x24xbf16>, vector<24x64xbf16>, vector<2x64xf32> -> vector<2x64xf32>
    %cst_46 = arith.constant 0.000000e+00 : f32
    %67 = vector.broadcast %cst_46 : f32 to vector<2x64xf32>
    %68 = arith.maximumf %66, %67 : vector<2x64xf32>
    %cst_47 = arith.constant dense<0.000000e+00> : vector<2x32xf32>
    %69 = tpu.matmul %68, %4, %cst_47 {dimension_numbers = #tpu.dot_dimension_numbers<[1], [0], [0], [1], [0, 0, 1, 1], [], []>} : vector<2x64xf32>, vector<64x32xf32>, vector<2x32xf32> -> vector<2x32xf32>
    %70 = vector.broadcast %10 : vector<1x32xf32> to vector<2x32xf32>
    %71 = arith.addf %69, %70 : vector<2x32xf32>
    %cst_48 = arith.constant 0.000000e+00 : f32
    %72 = vector.broadcast %cst_48 : f32 to vector<2x32xf32>
    %73 = arith.maximumf %71, %72 : vector<2x32xf32>
    %cst_49 = arith.constant dense<0.000000e+00> : vector<2x1xf32>
    %74 = tpu.matmul %73, %5, %cst_49 {dimension_numbers = #tpu.dot_dimension_numbers<[1], [0], [0], [1], [0, 0, 1, 1], [], []>} : vector<2x32xf32>, vector<32x1xf32>, vector<2x1xf32> -> vector<2x1xf32>
    %75 = vector.broadcast %11 : vector<1x1xf32> to vector<2x1xf32>
    %76 = arith.addf %74, %75 : vector<2x1xf32>
    %77 = arith.subf %76, %23 : vector<2x1xf32>
    %78 = arith.mulf %77, %77 : vector<2x1xf32>
    %79 = vector.shape_cast %78 : vector<2x1xf32> to vector<1x2x1xf32>
    %cst_50 = arith.constant dense<0.000000e+00> : vector<1xf32>
    %80 = vector.multi_reduction <add>, %79, %cst_50 [1, 2] : vector<1x2x1xf32> to vector<1xf32>
    %81 = vector.shape_cast %80 : vector<1xf32> to vector<1x1x1xf32>
    %82 = vector.extract %81[0, 0, 0] : f32 from vector<1x1x1xf32>
    %83 = vector.broadcast %82 : f32 to vector<1x1xf32>
    %cst_51 = arith.constant 2.000000e+00 : f32
    %84 = vector.broadcast %cst_51 : f32 to vector<1x1xf32>
    %85 = arith.divf %83, %84 : vector<1x1xf32>
    %86 = math.absf %77 : vector<2x1xf32>
    %87 = vector.shape_cast %86 : vector<2x1xf32> to vector<1x2x1xf32>
    %cst_52 = arith.constant dense<0.000000e+00> : vector<1xf32>
    %88 = vector.multi_reduction <add>, %87, %cst_52 [1, 2] : vector<1x2x1xf32> to vector<1xf32>
    %89 = vector.shape_cast %88 : vector<1xf32> to vector<1x1x1xf32>
    %90 = vector.extract %89[0, 0, 0] : f32 from vector<1x1x1xf32>
    %91 = vector.broadcast %90 : f32 to vector<1x1xf32>
    %cst_53 = arith.constant 2.000000e+00 : f32
    %92 = vector.broadcast %cst_53 : f32 to vector<1x1xf32>
    %93 = arith.divf %91, %92 : vector<1x1xf32>
    %94 = tpu.iota {dimensions = array<i32: 1>} : vector<2x128xi32>
    %c0_i32 = arith.constant 0 : i32
    %95 = vector.broadcast %c0_i32 : i32 to vector<2x128xi32>
    %96 = arith.cmpi eq, %94, %95 : vector<2x128xi32>
    %c1_i32 = arith.constant 1 : i32
    %97 = vector.broadcast %c1_i32 : i32 to vector<2x128xi32>
    %98 = arith.cmpi eq, %94, %97 : vector<2x128xi32>
    %c2_i32 = arith.constant 2 : i32
    %99 = vector.broadcast %c2_i32 : i32 to vector<2x128xi32>
    %100 = arith.cmpi eq, %94, %99 : vector<2x128xi32>
    %cst_54 = arith.constant 0.000000e+00 : f32
    %101 = vector.shape_cast %93 : vector<1x1xf32> to vector<1x1xf32>
    %102 = vector.broadcast %101 : vector<1x1xf32> to vector<2x128xf32>
    %103 = vector.broadcast %cst_54 : f32 to vector<2x128xf32>
    %104 = arith.select %100, %102, %103 : vector<2x128xi1>, vector<2x128xf32>
    %105 = vector.shape_cast %85 : vector<1x1xf32> to vector<1x1xf32>
    %106 = vector.broadcast %105 : vector<1x1xf32> to vector<2x128xf32>
    %107 = arith.select %98, %106, %104 : vector<2x128xi1>, vector<2x128xf32>
    %108 = vector.shape_cast %76 : vector<2x1xf32> to vector<2x1xf32>
    %109 = vector.broadcast %108 : vector<2x1xf32> to vector<2x128xf32>
    %110 = arith.select %96, %109, %107 : vector<2x128xi1>, vector<2x128xf32>
    %c0_55 = arith.constant 0 : index
    %c0_56 = arith.constant 0 : index
    %c0_57 = arith.constant 0 : index
    %111 = vector.load %arg8[%c0_55, %c0_56, %c0_57] : memref<1x2x128xf32, #tpu.memory_space<vmem>>, vector<1x2x128xf32>
    %112 = vector.shape_cast %111 : vector<1x2x128xf32> to vector<2x128xf32>
    %113 = vector.shape_cast %110 : vector<2x128xf32> to vector<1x2x128xf32>
    tpu.vector_store %arg8[%c0_55, %c0_56, %c0_57], %113 {strides = array<i32>} : memref<1x2x128xf32, #tpu.memory_space<vmem>>, vector<1x2x128xf32>,
    return
  }
  func.func @transform_0(%arg0: i32) -> (i32, i32, i32) {
    %c0_i32 = arith.constant 0 : i32
    %c0_i32_0 = arith.constant 0 : i32
    %c0_i32_1 = arith.constant 0 : i32
    return %arg0, %c0_i32, %c0_i32_0 : i32, i32, i32
  }
  func.func @transform_1(%arg0: i32) -> (i32, i32, i32) {
    %c0_i32 = arith.constant 0 : i32
    %c0_i32_0 = arith.constant 0 : i32
    %c0_i32_1 = arith.constant 0 : i32
    return %arg0, %c0_i32, %c0_i32_0 : i32, i32, i32
  }
  func.func @transform_2(%arg0: i32) -> (i32, i32, i32) {
    %c0_i32 = arith.constant 0 : i32
    %c0_i32_0 = arith.constant 0 : i32
    %c0_i32_1 = arith.constant 0 : i32
    return %arg0, %c0_i32, %c0_i32_0 : i32, i32, i32
  }
  func.func @transform_3(%arg0: i32) -> (i32, i32, i32) {
    %c0_i32 = arith.constant 0 : i32
    %c0_i32_0 = arith.constant 0 : i32
    %c0_i32_1 = arith.constant 0 : i32
    return %arg0, %c0_i32, %c0_i32_0 : i32, i32, i32
  }
  func.func @transform_4(%arg0: i32) -> (i32, i32, i32) {
    %c0_i32 = arith.constant 0 : i32
    %c0_i32_0 = arith.constant 0 : i32
    %c0_i32_1 = arith.constant 0 : i32
    return %arg0, %c0_i32, %c0_i32_0 : i32, i32, i32
  }
  func.func @transform_5(%arg0: i32) -> (i32, i32, i32) {
    %c0_i32 = arith.constant 0 : i32
    %c0_i32_0 = arith.constant 0 : i32
    %c0_i32_1 = arith.constant 0 : i32
    return %arg0, %c0_i32, %c0_i32_0 : i32, i32, i32
  }
  func.func @transform_6(%arg0: i32) -> (i32, i32) {
    %c0_i32 = arith.constant 0 : i32
    %c0_i32_0 = arith.constant 0 : i32
    %c0_i32_1 = arith.constant 0 : i32
    return %c0_i32, %c0_i32_0 : i32, i32
  }
  func.func @transform_7(%arg0: i32) -> (i32, i32, i32) {
    %c0_i32 = arith.constant 0 : i32
    %c0_i32_0 = arith.constant 0 : i32
    %c0_i32_1 = arith.constant 0 : i32
    return %arg0, %c0_i32, %c0_i32_0 : i32, i32, i32
  }
}

</mosaic_0001>

<bundles_post_ra>
// kernel: tpu_custom_call.1
= control target key start
LH: loop header
LB: loop body
LE: loop exit
PB: predicated region body
PF: predicated region fallthrough
CT: control target
= control target key end

     0   :  { %12 = vsyncpa [#allocation3], 0  ;;  %s2480_s0 = inlined_call_operand.vmem [shape: f32[8,24,16], index: 0, kind: input, shape index: {}]   ;;  %s2481_s1 = inlined_call_operand.vmem [shape: f32[8,40,8], index: 1, kind: input, shape index: {}]   ;;  %s2482_s2 = inlined_call_operand.vmem [shape: bf16[8,24,24], index: 2, kind: input, shape index: {}]   ;;  %s2483_s3 = inlined_call_operand.vmem [shape: bf16[8,24,40], index: 3, kind: input, shape index: {}]   ;;  %s2484_s4 = inlined_call_operand.vmem [shape: bf16[8,2,24], index: 4, kind: input, shape index: {}]   ;;  %s2485_s5 = inlined_call_operand.vmem [shape: f32[8,2,1], index: 5, kind: input, shape index: {}]   ;;  %s2486_s6 = inlined_call_operand.vmem [shape: f32[192,128], index: 6, kind: input, shape index: {}]   ;;  %s2487_s7 = inlined_call_operand.hbm [shape: f32[8,2,128], index: 7, kind: output, shape index: {}]  }
   0x1   :  { %14 = vsyncpa [#allocation3 + $0x1], 0  ;;  %s2140_s24 = smov 0   ;;  %s2142_s25 = smov 0  }
   0x2   :  { %s2144_s26 = smov 0   ;;  %s2146_s27 = smov 0  }
   0x3 LB: > { %s2161_s28 = sadd.s32 4294967295, %s2093_s27   ;;  %s1625_s29 = sadd.s32 4294967294, %s2093_s27   ;;  %s2093_s27 = sphi %s2146_s27, %s2495_s27   ;;  %s2089_s26 = sphi %s2144_s26, %s2494_s26   ;;  %s2085_s25 = sphi %s2142_s25, %s2493_s25   ;;  %s2081_s24 = sphi %s2140_s24, %s2492_s24  }
   0x4   : > { %s2165_s30 = sadd.s32 1, %s2093_s27   ;;  %s204_s8 = sadd.s32 1, %s2089_s26 }
   0x5   : > { %s201_s9 = ssub.s32 %s2093_s27, %s2165_s30  ;;  %p214_p0 = scmp.ne.s32.totalorder %s2089_s26, %s2085_s25 }
   0x6   : > { %p202_p1 = scmp.eq.s32.totalorder %s201_s9, 0  ;;  %p215_p2 = scmp.eq.s32.totalorder %s2161_s28, 7 }
   0x7   : > { %p220_p3 = scmp.ne.s32.totalorder %s2085_s25, %s2081_s24  ;;  %p221_p4 = scmp.eq.s32.totalorder %s1625_s29, 7 }
   0x8   : > { %s2176_s10 = scalar_select %p202_p1, %s2089_s26, %s204_s8  }
   0x9   : > { %p2178_p5 = por %p215_p2, %p214_p0  ;;  %p2182_p6 = por %p221_p4, %p220_p3 }
   0xa   : > { %2488 = sst [smem:[#allocation5_spill]] %s2176_s10  ;;  %p1628_p7 = scmp.ge.s32.totalorder %s2093_s27, 1 }
   0xb   : > { %p287_p8 = scmp.lt.s32.totalorder %s2093_s27, 9 }
   0xd   : > { %p288_p9 = pnand %p1628_p7, %p287_p8 }
   0xe   : > { %p341_p10 = scmp.lt.s32.totalorder (!%p288_p9), %s2161_s28, 7  ;;  %v369_v0 = vld [vmem:[%s2486_s6] sm:$0xff] (!%p288_p9)  ;;  %v370_v1 = vld [vmem:[%s2486_s6 + $0x8] sm:$0xff] (!%p288_p9)  ;;  %v2095_v2 = vmov (!%p288_p9), 0.0|0.0   ;;  %vm2096_vm0 = vmmov (!%p288_p9), 0   ;;  %v2097_v4 = vmov (!%p288_p9), 0.0  }
   0xf   : > { %291 = sbr.rel (%p288_p9) target bundleno = 2904 (0xb58), region = 48  ;;  %1913 = vmatprep.subr.bf16.mxu0 (!%p288_p9), %v2095_v2  ;;  %v1914_v3 = vpack.c.bf16 (!%p288_p9), %v370_v1, %v369_v0  ;;  %1753 = vmatprep.mubr.msk.f32.mxu0 (!%p288_p9), %vm2096_vm0, %v2097_v4  ;;  %vm418_vm1 = vcmask (!%p288_p9), 130048   ;;  %vm519_vm2 = vcmask (!%p288_p9), 326656   ;;  %v371_v14 = vld [vmem:[%s2486_s6 + $0x10] sm:$0xff] (!%p288_p9)  ;;  %vm526_vm3 = vcmask (!%p288_p9), 1043456   ;;  %v372_v32 = vld [vmem:[%s2486_s6 + $0x18] sm:$0xff] (!%p288_p9) }
  0x10   : > { %vm597_vm4 = vcmask (!%p288_p9), 64512   ;;  %vm710_vm5 = vcmask (!%p288_p9), 195584   ;;  %v373_v33 = vld [vmem:[%s2486_s6 + $0x20] sm:$0xff] (!%p288_p9)  ;;  %v374_v34 = vld [vmem:[%s2486_s6 + $0x28] sm:$0xff] (!%p288_p9)  ;;  %v375_v36 = vld [vmem:[%s2486_s6 + $0x30] sm:$0xff] (!%p288_p9)  ;;  %vm768_vm6 = vcmask (!%p288_p9), 261120  }
  0x11   : > { %1915 = vmatpush3.bf16.msra.mxu0 (!%p288_p9), %v1914_v3  ;;  %v2256_v35 = vpack.c.bf16 (!%p288_p9), %v373_v33, %v372_v32  ;;  %v2262_v37 = vpack.c.bf16 (!%p288_p9), %v375_v36, %v374_v34  ;;  %v1643_v39 = vld [vmem:[%s2486_s6 + $0xb9] ss:$0 sm:$0xff] (!%p288_p9)  ;;  %v1635_v42 = vld [vmem:[%s2486_s6 + $0xb8] ss:$0 sm:$0xff] (!%p288_p9)  ;;  %vm1300_vm7 = vcmask (!%p288_p9), 523264   ;;  %vm1454_vm8 = vcmask (!%p288_p9), 1024  }
  0x12   : > { %1772 = vmatprep.subr.mxu0 (!%p288_p9), %v2097_v4  ;;  %s1675_s13 = sshll.u32 (!%p288_p9), %s2161_s28, 5  ;;  %s2099_s21 = smov (!%p288_p9), [#allocation2]  }
  0x16   : > { %s2197_s17 = scalar_select %p341_p10, %s2161_s28, 7 }
  0x18   : > { %s1975_s18 = smul.u32 40, %s2197_s17 }
  0x19   : > { %s1976_s19 = smul.u32 12, %s2197_s17 }
  0x1a   : > { %s350_s22 = scalar_lea.vmem %s2481_s1, %s1975_s18  ;;  %s1974_s23 = smul.u32 24, %s2197_s17 }
  0x1b   : > { %v401_v5 = vld [vmem:[%s350_s22] sm:$0xff]  ;;  %v402_v6 = vld [vmem:[%s350_s22 + $0x8] sm:$0xff]  ;;  %v403_v7 = vld [vmem:[%s350_s22 + $0x10] sm:$0xff]  ;;  %s2211_s9 = scalar_lea.vmem %s2482_s2, %s1976_s19  ;;  %s360_s15 = scalar_lea.vmem %s2483_s3, %s1976_s19 }
  0x1c   : > { %v508_v8 = vpack.c.bf16 %v402_v6, %v401_v5  ;;  %v404_v9 = vld [vmem:[%s350_s22 + $0x18] sm:$0xff]  ;;  %s345_s20 = scalar_lea.vmem %s2480_s0, %s1974_s23  ;;  %v405_v11 = vld [vmem:[%s350_s22 + $0x20] sm:$0xff]  ;;  %v411_v17 = vld [vmem:[%s360_s15 + $0x8] sm:$0xf]  ;;  %s1634_s18 = sshll.u32 %s2197_s17, 1 }
  0x1d   : > { %v509_v10 = vpack.c.bf16 %v404_v9, %v403_v7  ;;  %v409_v12 = vld [vmem:[%s360_s15] sm:$0xff]   ;;  %v510_v15 = vpack.c.bf16 %v405_v11, %v405_v11  ;;  %v399_v16 = vld [vmem:[%s345_s20 + $0x8] sm:$0xff]  ;;  %v400_v19 = vld [vmem:[%s345_s20 + $0x10] sm:$0xff]  ;;  %v1640_v20 = vcombine.low %v411_v17, %v411_v17  ;;  %v580_v23 = vunpack.c.l.bf16 %v411_v17  ;;  %s367_s10 = scalar_lea.vmem %s2485_s5, %s1634_s18  ;;  %s2438_s18 = scalar_lea.hbm %s2487_s7, %s1675_s13 }
  0x1e   : > { %1762 = vmatprep.subr.bf16.mxu1 %v508_v8  ;;  %v398_v13 = vld [vmem:[%s345_s20] sm:$0xff]  ;;  %1768 = vmatprep.mubr.msk.bf16.mxu1 %vm519_vm2, %v409_v12  ;;  %v578_v21 = vunpack.c.l.bf16 %v409_v12  ;;  %v579_v22 = vunpack.c.h.bf16 %v409_v12  ;;  %v2273_v63 = vld [vmem:[%s2211_s9 + $0x8] ss:$0 sps:$4 sm:$0xff]   ;;  %v1647_v7 = vld [vmem:[%s2486_s6 + $0xba] ss:$0 sm:$0xff]  ;;  %s363_s20 = scalar_lea.vmem %s2484_s4, %s2197_s17  ;;  %s338_s17 = sand.u32 1, %s2085_s25  }
  0x1f   : > { %1763 = vmatpush3.bf16.msra.mxu1 %v508_v8  ;;  %1754 = vmatmul.mubr.msk.f32.vlgmr.msra.gmra.mrb[0].mxu0 %vm418_vm1, %v398_v13  ;;  %v528_v18 = vsel %vm526_vm3, %v510_v15, 0  ;;  %v587_v25 = vsel %vm519_vm2, %v580_v23, 0.0  ;;  %v2029_v31 = vld [vmem:[%s2211_s9] sm:$0xff]   ;;  %s1629_s23 = sshll.u32 %s338_s17, 1  ;;  %s1496_s9 = scalar_lea.sflag [#allocation3], %s338_s17 }
  0x20   : > { %1764 = vmatprep.subr.bf16.mxu1 %v509_v10  ;;  %1756 = vmatprep.mubr.msk.f32.mxu0 %vm2096_vm0, %v2097_v4  ;;  %v581_v24 = vsel %vm519_vm2, %v578_v21, 0.0  ;;  %v584_v26 = vsel %vm519_vm2, %v579_v22, 0.0  ;;  %s340_s14 = scalar_lea.vmem [#allocation2], %s1629_s23 }
  0x21   : > { %1773 = vmatpush3.msra.mxu0 %v371_v14  ;;  %582 = vadd.xlane.f32.xlu0 %v581_v24  ;;  %s1509_s15 = sshll.u32 %s340_s14, 4  ;;  %s2440_s15 = int_to_ptr.vmem [resolvable:$true] %s1509_s15 }
  0x22   : > { %1916 = vmatprep.subr.bf16.mxu0 %v2095_v2  ;;  %588 = vadd.xlane.f32.xlu1 %v587_v25  ;;  %s2031_s28 = scalar_lea.vmem %s2440_s15, 32 }
  0x23   : > { %1765 = vmatpush3.bf16.msra.mxu1 %v509_v10  ;;  %1757 = vmatmul.mubr.msk.f32.gmra.mrb[2].mxu0 %vm418_vm1, %v399_v16  ;;  %p2032_p11 = scmp.ne.s32.totalorder %s2440_s15, %s2031_s28 }
  0x24   : > { %1970 = vmatprep.subr.msk.bf16.mxu1 %vm526_vm3, %v510_v15  ;;  %1759 = vmatprep.mubr.msk.f32.mxu0 %vm2096_vm0, %v2097_v4 }
  0x25   : > { %585 = vadd.xlane.f32.xlu0 %v584_v26  ;;  %p2033_p12 = pnand %p2032_p11, %p2178_p5 }
  0x27   : > { %1767 = vmatpush3.bf16.msra.mxu1 %v528_v18  ;;  %1760 = vmatmul.mubr.msk.f32.gmra.mrb[4].mxu0 %vm418_vm1, %v400_v19  ;;  %p2034_p13 = pneg %p2033_p12 }
  0x28   : > { %1774 = vmatprep.mubr.msk.f32.mxu0 %vm2096_vm0, %v2097_v4 }
  0x2a   : > { %1769 = vmatmul.mubr.msk.bf16.vlgmr.msra.gmra.mrb[0].mxu1 %vm519_vm2, %v1640_v20 }
  0x2b   : > { %1787 = vmatprep.mubr.msk.bf16.mxu1 %vm710_vm5, %v2029_v31 }
  0xae   : > { %v583_v38 = vpop.xlane.xlu0 %582 }
  0xaf   : > { %v594_v41 = vmul.f32 %v1643_v39, %v583_v38  ;;  %v589_v44 = vpop.xlane.xlu1 %588 }
  0xb0   : > { %v596_v48 = vmul.f32 %v1643_v39, %v589_v44 }
  0xb1   : > { %v1958_v45 = vadd.f32 %v1635_v42, %v594_v41 }
  0xb2   : > { %v586_v40 = vpop.xlane.xlu0 %585  ;;  %v1962_v54 = vadd.f32 %v1635_v42, %v596_v48  ;;  %v377_v48 = vld [vmem:[%s2486_s6 + $0x40] sm:$0xff] }
  0xb3   : > { %v595_v43 = vmul.f32 %v1643_v39, %v586_v40 }
  0xb5   : > { %v1960_v49 = vadd.f32 %v1635_v42, %v595_v43 }
  0xfd   : > { %v1770_v27 = vpop.f32.mrb[0].mxu1 }
  0xfe   : > { %v564_v28 = vpop.f32.mrb[1].mxu1 }
  0xff   : > { %v1771_v29 = vpop.f32.mrb[2].mxu1  ;;  %1775 = vmatmul.mubr.msk.f32.vlgmr.msra.gmra.mrb[0].mxu0 %vm597_vm4, %v564_v28 }
 0x100   : > { %v567_v30 = vpop.f32.mrb[3].mxu1  ;;  %1777 = vmatprep.mubr.msk.f32.mxu0 %vm2096_vm0, %v2097_v4  ;;  %1918 = vmatpush3.bf16.msra.mxu0 %v2256_v35 }
 0x101   : > { %1919 = vmatprep.subr.bf16.mxu0 %v2095_v2 }
 0x103   : > { %1778 = vmatmul.mubr.msk.f32.gmra.mrb[2].mxu0 %vm597_vm4, %v567_v30 }
 0x104   : > { %1780 = vmatprep.mubr.msk.f32.mxu0 %vm2096_vm0, %v2097_v4  ;;  %1921 = vmatpush3.bf16.msra.mxu0 %v2262_v37 }
 0x107   : > { %1781 = vmatmul.mubr.msk.f32.gmra.mrb[4].mxu0 %vm597_vm4, %v1770_v27 }
 0x108   : > { %1799 = vmatprep.mubr.msk.f32.mxu0 %vm2096_vm0, %v2097_v4 }
 0x1d2   : > { %v673_v46 = vpop.f32.mrb[0].mxu0 }
 0x1d3   : > { %v1776_v47 = vpop.f32.mrb[1].mxu0  ;;  %v1959_v50 = vadd.f32 %v1958_v45, %v673_v46 }
 0x1d4   : > { %v376_v47 = vld [vmem:[%s2486_s6 + $0x38] sm:$0xff] }
 0x1d5   : > { %v690_v55 = vmax.f32 %v1959_v50, 0.0  ;;  %v2291_v9 = vadd.f32 %v1959_v50, %v1647_v7 }
 0x1d6   : > { %v678_v51 = vpop.f32.mrb[2].mxu0 }
 0x1d7   : > { %v1961_v52 = vadd.f32 %v1960_v49, %v678_v51  ;;  %v1779_v53 = vpop.f32.mrb[3].mxu0  ;;  %v1935_v49 = vpack.c.bf16 %v377_v48, %v376_v47 }
 0x1d8   : > { %v379_v53 = vld [vmem:[%s2486_s6 + $0x50] sm:$0xff] }
 0x1d9   : > { %v691_v56 = vmax.f32 %v1961_v52, 0.0  ;;  %v2293_v11 = vadd.f32 %v1961_v52, %v1647_v7  ;;  %v378_v52 = vld [vmem:[%s2486_s6 + $0x48] sm:$0xff] }
 0x1da   : > { %v683_v57 = vpop.f32.mrb[4].mxu0 }
 0x1db   : > { %v1963_v58 = vadd.f32 %v1962_v54, %v683_v57  ;;  %v1782_v59 = vpop.f32.mrb[5].mxu0  ;;  %v700_v60 = vpack.c.bf16 %v691_v56, %v690_v55  ;;  %v1938_v54 = vpack.c.bf16 %v379_v53, %v378_v52 }
 0x1dd   : > { %v692_v61 = vmax.f32 %v1963_v58, 0.0  ;;  %1783 = vmatprep.subr.bf16.mxu1 %v700_v60  ;;  %v2297_v16 = vadd.f32 %v1963_v58, %v1647_v7  ;;  %v382_v7 = vld [vmem:[%s2486_s6 + $0x68] sm:$0xff] }
 0x1de   : > { %1784 = vmatpush3.bf16.msra.mxu1 %v700_v60 }
 0x1df   : > { %v701_v62 = vpack.c.bf16 %v692_v61, %v692_v61 }
 0x1e1   : > { %1971 = vmatprep.subr.msk.bf16.mxu1 %vm526_vm3, %v701_v62  ;;  %v718_v0 = vsel %vm526_vm3, %v701_v62, 0 }
 0x1e2   : > { %1786 = vmatpush3.bf16.msra.mxu1 %v718_v0 }
 0x1e5   : > { %1788 = vmatmul.mubr.msk.bf16.vlgmr.msra.gmra.mrb[4].mxu1 %vm710_vm5, %v2273_v63 }
 0x1e6   : > { %1812 = vmatprep.mubr.msk.bf16.mxu1 %vm710_vm5, %v2029_v31 }
 0x2b8   : > { %v1789_v1 = vpop.f32.mrb[4].mxu1 }
 0x2b9   : > { %v754_v3 = vpop.f32.mrb[5].mxu1 }
 0x2ba   : > { %v1790_v5 = vpop.f32.mrb[6].mxu1  ;;  %1800 = vmatmul.mubr.msk.f32.vlgmr.msra.gmra.mrb[6].mxu0 %vm768_vm6, %v754_v3 }
 0x2bb   : > { %v757_v6 = vpop.f32.mrb[7].mxu1  ;;  %1802 = vmatprep.mubr.msk.f32.mxu0 %vm2096_vm0, %v2097_v4  ;;  %v380_v5 = vld [vmem:[%s2486_s6 + $0x58] sm:$0xff] }
 0x2be   : > { %1803 = vmatmul.mubr.msk.f32.gmra.mrb[8].mxu0 %vm768_vm6, %v757_v6  ;;  %v381_v6 = vld [vmem:[%s2486_s6 + $0x60] sm:$0xff] }
 0x2bf   : > { %1805 = vmatprep.mubr.msk.f32.mxu0 %vm2096_vm0, %v2097_v4 }
 0x2c2   : > { %1806 = vmatmul.mubr.msk.f32.gmra.mrb[10].mxu0 %vm768_vm6, %v1789_v1 }
 0x2c3   : > { %1837 = vmatprep.mubr.msk.bf16.mxu0 %vm710_vm5, %v2029_v31 }
 0x38d   : > { %v844_v8 = vpop.f32.mrb[6].mxu0 }
 0x38e   : > { %v1801_v10 = vpop.f32.mrb[7].mxu0  ;;  %v845_v12 = vadd.f32 %v844_v8, %v2291_v9  ;;  %v1941_v8 = vpack.c.bf16 %v381_v6, %v380_v5 }
 0x390   : > { %v858_v17 = vmax.f32 %v845_v12, 0.0  ;;  %v385_v12 = vld [vmem:[%s2486_s6 + $0x80] sm:$0xff] }
 0x391   : > { %v849_v13 = vpop.f32.mrb[8].mxu0 }
 0x392   : > { %v850_v14 = vadd.f32 %v849_v13, %v2293_v11  ;;  %v1804_v15 = vpop.f32.mrb[9].mxu0 }
 0x394   : > { %v859_v18 = vmax.f32 %v850_v14, 0.0  ;;  %v1665_v14 = vld [vmem:[%s2486_s6 + $0xbb] ss:$0 sm:$0xff] }
 0x395   : > { %v854_v19 = vpop.f32.mrb[10].mxu0 }
 0x396   : > { %v861_v20 = vpack.c.bf16 %v859_v18, %v858_v17  ;;  %v855_v21 = vadd.f32 %v854_v19, %v2297_v16  ;;  %v1807_v22 = vpop.f32.mrb[11].mxu0 }
 0x398   : > { %v860_v23 = vmax.f32 %v855_v21, 0.0  ;;  %1808 = vmatprep.subr.bf16.mxu1 %v861_v20 }
 0x399   : > { %1809 = vmatpush3.bf16.msra.mxu1 %v861_v20 }
 0x39a   : > { %v862_v24 = vpack.c.bf16 %v860_v23, %v860_v23 }
 0x39c   : > { %1972 = vmatprep.subr.msk.bf16.mxu1 %vm526_vm3, %v862_v24  ;;  %v864_v25 = vsel %vm526_vm3, %v862_v24, 0 }
 0x39d   : > { %1811 = vmatpush3.bf16.msra.mxu1 %v864_v25 }
 0x39e   : > { %1922 = vmatprep.subr.bf16.mxu1 %v2095_v2 }
 0x3a0   : > { %1813 = vmatmul.mubr.msk.bf16.vlgmr.msra.gmra.mrb[8].mxu1 %vm710_vm5, %v2273_v63 }
 0x3a1   : > { %1924 = vmatpush3.bf16.msra.mxu1 %v2256_v35  ;;  %1824 = vmatprep.mubr.msk.f32.mxu1 %vm2096_vm0, %v2097_v4 }
 0x3a2   : > { %1925 = vmatprep.subr.bf16.mxu1 %v2095_v2 }
 0x3a5   : > { %1927 = vmatpush3.bf16.msra.mxu1 %v2262_v37 }
 0x3a6   : > { %1934 = vmatprep.subr.bf16.mxu1 %v2095_v2 }
 0x473   : > { %v1814_v26 = vpop.f32.mrb[8].mxu1 }
 0x474   : > { %v900_v27 = vpop.f32.mrb[9].mxu1 }
 0x475   : > { %v1815_v28 = vpop.f32.mrb[10].mxu1  ;;  %1825 = vmatmul.mubr.msk.f32.vlgmr.msra.gmra.mrb[12].mxu1 %vm768_vm6, %v900_v27 }
 0x476   : > { %v903_v29 = vpop.f32.mrb[11].mxu1  ;;  %1827 = vmatprep.mubr.msk.f32.mxu1 %vm2096_vm0, %v2097_v4  ;;  %1936 = vmatpush3.bf16.msra.mxu1 %v1935_v49 }
 0x477   : > { %1937 = vmatprep.subr.bf16.mxu1 %v2095_v2 }
 0x479   : > { %1828 = vmatmul.mubr.msk.f32.gmra.mrb[14].mxu1 %vm768_vm6, %v903_v29 }
 0x47a   : > { %1830 = vmatprep.mubr.msk.f32.mxu1 %vm2096_vm0, %v2097_v4  ;;  %1939 = vmatpush3.bf16.msra.mxu1 %v1938_v54 }
 0x47b   : > { %1940 = vmatprep.subr.bf16.mxu1 %v2095_v2 }
 0x47d   : > { %1831 = vmatmul.mubr.msk.f32.gmra.mrb[16].mxu1 %vm768_vm6, %v1814_v26 }
 0x47e   : > { %1866 = vmatprep.mubr.msk.f32.mxu1 %vm2096_vm0, %v2097_v4 }
 0x548   : > { %v989_v30 = vpop.f32.mrb[12].mxu1 }
 0x549   : > { %v1826_v31 = vpop.f32.mrb[13].mxu1  ;;  %v990_v32 = vadd.f32 %v989_v30, %v2291_v9  ;;  %v412_v30 = vld [vmem:[%s363_s20] sm:$0x1] }
 0x54a   : > { %v386_v31 = vld [vmem:[%s2486_s6 + $0x88] sm:$0xff] }
 0x54b   : > { %v1003_v38 = vmax.f32 %v990_v32, 0.0  ;;  %v387_v32 = vld [vmem:[%s2486_s6 + $0x90] sm:$0xff] }
 0x54c   : > { %v994_v33 = vpop.f32.mrb[14].mxu1 }
 0x54d   : > { %v995_v34 = vadd.f32 %v994_v33, %v2293_v11  ;;  %v1829_v36 = vpop.f32.mrb[15].mxu1  ;;  %v1950_v33 = vpack.c.bf16 %v387_v32, %v386_v31 }
 0x54e   : > { %v389_v36 = vld [vmem:[%s2486_s6 + $0xa0] sm:$0xff] }
 0x54f   : > { %v1004_v39 = vmax.f32 %v995_v34, 0.0  ;;  %v388_v34 = vld [vmem:[%s2486_s6 + $0x98] sm:$0xff] }
 0x550   : > { %v999_v40 = vpop.f32.mrb[16].mxu1 }
 0x551   : > { %v1006_v41 = vpack.c.bf16 %v1004_v39, %v1003_v38  ;;  %v1000_v42 = vadd.f32 %v999_v40, %v2297_v16  ;;  %v1832_v43 = vpop.f32.mrb[17].mxu1  ;;  %v1953_v38 = vpack.c.bf16 %v389_v36, %v388_v34 }
 0x552   : > { %v390_v43 = vld [vmem:[%s2486_s6 + $0xa8] sm:$0xff] }
 0x553   : > { %v1005_v44 = vmax.f32 %v1000_v42, 0.0  ;;  %1833 = vmatprep.subr.bf16.mxu0 %v1006_v41 }
 0x554   : > { %1834 = vmatpush3.bf16.msra.mxu0 %v1006_v41 }
 0x555   : > { %v1007_v45 = vpack.c.bf16 %v1005_v44, %v1005_v44  ;;  %v391_v44 = vld [vmem:[%s2486_s6 + $0xb0] sm:$0xff] }
 0x557   : > { %1973 = vmatprep.subr.msk.bf16.mxu0 %vm526_vm3, %v1007_v45  ;;  %v1009_v46 = vsel %vm526_vm3, %v1007_v45, 0  ;;  %v1956_v45 = vpack.c.bf16 %v391_v44, %v390_v43 }
 0x558   : > { %1836 = vmatpush3.bf16.msra.mxu0 %v1009_v46 }
 0x559   : > { %1928 = vmatprep.subr.bf16.mxu0 %v2095_v2 }
 0x55b   : > { %1838 = vmatmul.mubr.msk.bf16.vlgmr.msra.gmra.mrb[12].mxu0 %vm710_vm5, %v2273_v63 }
 0x55c   : > { %1930 = vmatpush3.bf16.msra.mxu0 %v2256_v35  ;;  %1849 = vmatprep.mubr.msk.f32.mxu0 %vm2096_vm0, %v2097_v4 }
 0x55d   : > { %1931 = vmatprep.subr.bf16.mxu0 %v2095_v2 }
 0x560   : > { %1933 = vmatpush3.bf16.msra.mxu0 %v2262_v37 }
 0x561   : > { %1875 = vmatprep.subr.bf16.mxu0 %v2097_v4 }
 0x62e   : > { %v1839_v35 = vpop.f32.mrb[12].mxu0 }
 0x62f   : > { %v1045_v50 = vpop.f32.mrb[13].mxu0 }
 0x630   : > { %v1840_v51 = vpop.f32.mrb[14].mxu0  ;;  %1850 = vmatmul.mubr.msk.f32.vlgmr.msra.gmra.mrb[16].mxu0 %vm768_vm6, %v1045_v50  ;;  %v1672_v50 = vld [vmem:[%s2486_s6 + $0xbd] ss:$0 sm:$0xff] }
 0x631   : > { %v1048_v37 = vpop.f32.mrb[15].mxu0  ;;  %1852 = vmatprep.mubr.msk.f32.mxu0 %vm2096_vm0, %v2097_v4  ;;  %v413_v51 = vld [vmem:[%s367_s10] sm:$0x3]  ;;  %s2035_s10 = sshll.u32 %s2099_s21, 4  ;;  %s2036_s10 = int_to_ptr.vmem [resolvable:$false] %s2035_s10 }
 0x632   : > { %s2037_s19 = scalar_lea.vmem %s2036_s10, 64  ;;  %p2038_p0 = scmp.lt.s32.totalorder %s2440_s15, %s2036_s10 }
 0x633   : > { %p2039_p1 = scmp.lt.s32.totalorder %s2037_s19, %s2031_s28 }
 0x634   : > { %1853 = vmatmul.mubr.msk.f32.gmra.mrb[18].mxu0 %vm768_vm6, %v1048_v37 }
 0x635   : > { %1855 = vmatprep.mubr.msk.f32.mxu0 %vm2096_vm0, %v2097_v4  ;;  %p2040_p2 = por %p2039_p1, %p2038_p0 }
 0x637   : > { %p2041_p3 = pnand %p2040_p2, %p2034_p13 }
 0x638   : > { %1856 = vmatmul.mubr.msk.f32.gmra.mrb[20].mxu0 %vm768_vm6, %v1839_v35  ;;  %v2098_v35 = vmov 0  }
 0x639   : > { %1879 = vmatprep.mubr.msk.bf16.mxu0 %vm2096_vm0, %v2097_v4  ;;  %2024 = vset.pattern.permute.xlu1 %v2098_v35 }
 0x63a   : > { %2025 = vset.pattern.permute.xlu0 %v2098_v35 }
 0x703   : > { %v1134_v55 = vpop.f32.mrb[16].mxu0 }
 0x704   : > { %v1135_v56 = vadd.f32 %v1134_v55, %v2291_v9  ;;  %v1851_v57 = vpop.f32.mrb[17].mxu0  ;;  %v383_v9 = vld [vmem:[%s2486_s6 + $0x70] sm:$0xff] }
 0x705   : > { %v1944_v10 = vpack.c.bf16 %v383_v9, %v382_v7 }
 0x706   : > { %v1148_v58 = vmax.f32 %v1135_v56, 0.0 }
 0x707   : > { %v1139_v59 = vpop.f32.mrb[18].mxu0 }
 0x708   : > { %v1140_v60 = vadd.f32 %v1139_v59, %v2293_v11  ;;  %v1854_v61 = vpop.f32.mrb[19].mxu0  ;;  %1867 = vmatmul.mubr.msk.f32.vlgmr.msra.gmra.mrb[18].mxu1 %vm768_vm6, %v1148_v58  ;;  %v384_v11 = vld [vmem:[%s2486_s6 + $0x78] sm:$0xff] }
 0x709   : > { %1869 = vmatprep.mubr.msk.f32.mxu1 %vm2096_vm0, %v2097_v4  ;;  %1942 = vmatpush3.bf16.msra.mxu1 %v1941_v8  ;;  %v1947_v13 = vpack.c.bf16 %v385_v12, %v384_v11  ;;  %v1481_v11 = vlaneseq }
 0x70a   : > { %v1149_v62 = vmax.f32 %v1140_v60, 0.0  ;;  %1943 = vmatprep.subr.bf16.mxu1 %v2095_v2 }
 0x70b   : > { %v1144_v63 = vpop.f32.mrb[20].mxu0  ;;  %v1482_v12 = vand.u32 127, %v1481_v11 }
 0x70c   : > { %v1145_v0 = vadd.f32 %v1144_v63, %v2297_v16  ;;  %v1857_v1 = vpop.f32.mrb[21].mxu0  ;;  %1870 = vmatmul.mubr.msk.f32.gmra.mrb[20].mxu1 %vm768_vm6, %v1149_v62 }
 0x70d   : > { %1872 = vmatprep.mubr.msk.f32.mxu1 %vm2096_vm0, %v2097_v4  ;;  %1945 = vmatpush3.bf16.msra.mxu1 %v1944_v10  ;;  %vm1485_vm9 = vcmp.eq.s32.totalorder %v1482_v12, 2  ;;  %vm1484_vm10 = vcmp.eq.s32.totalorder %v1482_v12, 1  ;;  %vm1483_vm11 = vcmp.eq.s32.totalorder %v1482_v12, 0 }
 0x70e   : > { %v1150_v3 = vmax.f32 %v1145_v0, 0.0  ;;  %1946 = vmatprep.subr.bf16.mxu1 %v2095_v2 }
 0x710   : > { %1873 = vmatmul.mubr.msk.f32.gmra.mrb[22].mxu1 %vm768_vm6, %v1150_v3 }
 0x711   : > { %1899 = vmatprep.mubr.msk.f32.mxu1 %vm2096_vm0, %v2097_v4  ;;  %1948 = vmatpush3.bf16.msra.mxu1 %v1947_v13 }
 0x712   : > { %1949 = vmatprep.subr.bf16.mxu1 %v2095_v2 }
 0x715   : > { %1951 = vmatpush3.bf16.msra.mxu1 %v1950_v33 }
 0x7db   : > { %v1230_v15 = vpop.f32.mrb[18].mxu1 }
 0x7dc   : > { %v1868_v16 = vpop.f32.mrb[19].mxu1  ;;  %v1231_v17 = vadd.f32 %v1665_v14, %v1230_v15 }
 0x7de   : > { %v1244_v21 = vmax.f32 %v1231_v17, 0.0 }
 0x7df   : > { %v1235_v18 = vpop.f32.mrb[20].mxu1 }
 0x7e0   : > { %v1236_v19 = vadd.f32 %v1665_v14, %v1235_v18  ;;  %v1871_v20 = vpop.f32.mrb[21].mxu1 }
 0x7e2   : > { %v1245_v22 = vmax.f32 %v1236_v19, 0.0 }
 0x7e3   : > { %v1240_v23 = vpop.f32.mrb[22].mxu1 }
 0x7e4   : > { %v1247_v24 = vpack.c.bf16 %v1245_v22, %v1244_v21  ;;  %v1241_v25 = vadd.f32 %v1665_v14, %v1240_v23  ;;  %v1874_v26 = vpop.f32.mrb[23].mxu1 }
 0x7e6   : > { %v1246_v27 = vmax.f32 %v1241_v25, 0.0  ;;  %1876 = vmatpush3.bf16.msra.mxu0 %v1247_v24 }
 0x7e7   : > { %1877 = vmatprep.subr.bf16.mxu0 %v2097_v4 }
 0x7e8   : > { %v1248_v28 = vpack.c.bf16 %v1246_v27, %v1246_v27 }
 0x7ea   : > { %v1253_v29 = vsel %vm526_vm3, %v1248_v28, 0 }
 0x7eb   : > { %1878 = vmatpush3.bf16.msra.mxu0 %v1253_v29 }
 0x7ec   : > { %1952 = vmatprep.subr.bf16.mxu0 %v2095_v2 }
 0x7ee   : > { %1880 = vmatmul.mubr.msk.bf16.vlgmr.msra.gmra.mrb[24].mxu0 %vm710_vm5, %v412_v30 }
 0x7ef   : > { %1910 = vmatprep.mubr.msk.f32.mxu0 %vm2096_vm0, %v2097_v4  ;;  %1954 = vmatpush3.bf16.msra.mxu0 %v1953_v38 }
 0x7f0   : > { %1955 = vmatprep.subr.bf16.mxu0 %v2095_v2  ;;  %v1670_v2 = vld [vmem:[%s2486_s6 + $0xbc] ss:$0 sm:$0xff] }
 0x7f3   : > { %1957 = vmatpush3.bf16.msra.mxu0 %v1956_v45 }
 0x8c1   : > { %v1289_v4 = vpop.f32.mrb[24].mxu0 }
 0x8c2   : > { %v1295_v39 = vmax.f32 %v1289_v4, 0.0  ;;  %v1881_v40 = vpop.f32.mrb[25].mxu0 }
 0x8c3   : > { %v1292_v41 = vpop.f32.mrb[26].mxu0 }
 0x8c4   : > { %1900 = vmatmul.mubr.msk.f32.vlgmr.msra.gmra.mrb[24].mxu1 %vm1300_vm7, %v1295_v39  ;;  %v1882_v42 = vpop.f32.mrb[27].mxu0 }
 0x997   : > { %v1370_v46 = vpop.f32.mrb[24].mxu1 }
 0x998   : > { %v1371_v47 = vadd.f32 %v1670_v2, %v1370_v46  ;;  %v1901_v48 = vpop.f32.mrb[25].mxu1 }
 0x99a   : > { %v1374_v49 = vmax.f32 %v1371_v47, 0.0 }
 0x99c   : > { %1911 = vmatmul.mubr.msk.f32.vlgmr.msra.gmra.mrb[22].mxu0 %vm768_vm6, %v1374_v49 }
 0xa6f   : > { %v1448_v37 = vpop.f32.mrb[22].mxu0 }
 0xa70   : > { %v1449_v52 = vadd.f32 %v1672_v50, %v1448_v37  ;;  %v1912_v53 = vpop.f32.mrb[23].mxu0 }
 0xa72   : > { %v1452_v54 = vsub.f32 %v1449_v52, %v413_v51 }
 0xa74   : > { %v1468_v55 = vand.u32 2147483647, %v1452_v54  ;;  %v1453_v56 = vmul.f32 %v1452_v54, %v1452_v54 }
 0xa76   : > { %v1469_v57 = vsel %vm1454_vm8, %v1468_v55, 0.0  ;;  %v1455_v58 = vsel %vm1454_vm8, %v1453_v56, 0.0 }
 0xa77   : > { %1470 = vadd.xlane.f32.xlu0 %v1469_v57  ;;  %1456 = vadd.xlane.f32.xlu1 %v1455_v58 }
 0xa88   : > { %1490 = vperm.xlu1 %2024, %v1449_v52  }
 0xb04   : > { %v1471_v59 = vpop.xlane.xlu0 %1470  ;;  %v1457_v60 = vpop.xlane.xlu1 %1456 }
 0xb05   : > { %v1472_v61 = vrot.slane %v1471_v59, 4  ;;  %v1458_v62 = vrot.slane %v1457_v60, 4 }
 0xb07   : > { %v1473_v63 = vadd.f32 %v1472_v61, %v1471_v59  ;;  %v1459_v0 = vadd.f32 %v1458_v62, %v1457_v60 }
 0xb08   : > { %v1491_v18 = vpop.permute.xlu1 %1490 }
 0xb09   : > { %v1474_v1 = vrot.slane %v1473_v63, 2  ;;  %v1460_v3 = vrot.slane %v1459_v0, 2 }
 0xb0b   : > { %v1475_v5 = vadd.f32 %v1474_v1, %v1473_v63  ;;  %v1461_v6 = vadd.f32 %v1460_v3, %v1459_v0 }
 0xb0d   : > { %v1462_v7 = vrot.slane %v1461_v6, 1  ;;  %v1476_v8 = vrot.slane %v1475_v5, 1 }
 0xb0f   : > { %v1463_v9 = vadd.f32 %v1462_v7, %v1461_v6  ;;  %v1477_v10 = vadd.f32 %v1476_v8, %v1475_v5 }
 0xb11   : > { %1977 = vpush %v1463_v9 }
 0xb12   : > { %1979 = vpush %v1477_v10 }
 0xb42   : > { %s1978_s29 = spop %1977 }
 0xb43   : > { %v1465_v13 = vstv %s1978_s29  ;;  %s1980_s8 = spop %1979 }
 0xb44   : > { %v1467_v14 = vmul.f32 0.5, %v1465_v13  ;;  %v1479_v15 = vstv %s1980_s8 }
 0xb45   : > { %v1480_v16 = vmul.f32 0.5, %v1479_v15 }
 0xb47   : > { %v1486_v17 = vsel %vm1485_vm9, %v1480_v16, 0.0 }
 0xb48   : > { %v1487_v19 = vsel %vm1484_vm10, %v1467_v14, %v1486_v17 }
 0xb49   : > { %v1493_v20 = vsel %vm1483_vm11, %v1491_v18, %v1487_v19 }
 0xb4a   : > { %1494 = vst [vmem:[%s340_s14] sm:$0x3] %v1493_v20 }
 0xb4b   : > { %2044 = shalt.err (!%p2041_p3)
}
 0xb4c   : > { %s2045_s22 = scalar_lea.hbm %s2438_s18, 32  ;;  %s2049_s29 = scalar_lea.hbm %s2487_s7, 256 }
 0xb4d   : > { %p2046_p4 = scmp.ne.s32.totalorder %s2438_s18, %s2045_s22  ;;  %p2050_p9 = scmp.lt.u32.totalorder %s2438_s18, %s2487_s7 }
 0xb4e   : > { %p2051_p10 = scmp.lt.u32.totalorder %s2049_s29, %s2045_s22  ;;  %p2053_p12 = scmp.lt.u32.totalorder %s2045_s22, %s2438_s18 }
 0xb4f   : > { %p2047_p7 = pnand %p2046_p4, %p2178_p5 }
 0xb50   : > { %p2052_p11 = por %p2051_p10, %p2050_p9 }
 0xb51   : > { %p2048_p8 = pneg %p2047_p7 }
 0xb52   : > { %p2054_p13 = por %p2053_p12, %p2052_p11 }
 0xb54   : > { %p2055_p0 = pnand %p2054_p13, %p2048_p8 }
 0xb56   : > { %2058 = shalt.err (!%p2055_p0)
}
 0xb57   : > { %1981 = dma.vmem_to_hbm [thread:$0]  (%p2178_p5), %s2440_s15, 32, %s2438_s18, %s1496_s9  }
 0xb58 PF: > { %p1987_p1 = scmp.ge.s32.totalorder %s2093_s27, 2  ;;  %s1521_s14 = sand.u32 1, %s2081_s24  }
 0xb59   : > { %s1522_s16 = scalar_lea.sflag [#allocation3], %s1521_s14 }
 0xb5a   : > { %p1984_p2 = pnand %p1987_p1, %p2182_p6 }
 0xb5c   : > { %2076 = dma.done.wait (!%p1984_p2), %s1522_s16, 32  }
 0xb5d   : > { %2078 = vsyncadd (!%p1984_p2), %s1522_s16, 4294967264  ;;  %s2491_s20 = sld [smem:[#allocation5_spill]]  ;;  %p17_p3 = scmp.ge.s32.totalorder %s2165_s30, 10  }
 0xb5e   : > { %s2492_s24 = smov %s2085_s25  ;;  %s2493_s25 = smov %s2089_s26 }
 0xb5f   : > { %s2495_s27 = smov %s2165_s30  ;;  %19 = sbr.rel (!%p17_p3) target bundleno = 3 (0x3), region = 98 }
 0xb63   : > { %s2494_s26 = smov %s2491_s20 }
 0xb66   :  { %1527 = vsyncpa [#allocation3], 1 }
 0xb67   :  { %1529 = vsyncpa [#allocation3 + $0x1], 1 }

</bundles_post_ra>
